<compile_context>
chip_gen: v5e
topology: v5e:2x2
jax: 0.10.0
libtpu: 0.0.40
codegen_flags: <defaults>
</compile_context>

<pallas_src>
import functools

import jax
import jax.numpy as jnp
from jax.experimental import pallas as pl
from jax.experimental.pallas import tpu as pltpu

BN_EPS = 1e-5


# --------------------------------------------------------------------------
# Hardware-aware sizing helpers
# --------------------------------------------------------------------------
def _tpu_budgets():
    """Returns (vmem_limit_bytes, per-kernel tile budget, min grid length)."""
    cap = 128 << 20
    try:
        info = pltpu.get_tpu_info()
        cap = int(getattr(info, "vmem_capacity_bytes", cap) or cap)
    except Exception:
        pass
    if cap <= (96 << 20):                    # v7x-class TensorCore: 64 MiB VMEM
        return (44 << 20, 10 << 20, 8)
    return (64 << 20, 20 << 20, 4)           # v5e / v6e: 128 MiB VMEM


def _round_up(a, b):
    return (a + b - 1) // b * b


def _resident_spec(shape, index_map):
    """Constant-index (VMEM-resident) operand; single-buffered when supported."""
    try:
        return pl.BlockSpec(shape, index_map, pipeline_mode=pl.Buffered(1))
    except (AttributeError, TypeError):
        return pl.BlockSpec(shape, index_map)


def _pick_tm(m, row_bytes, resident_bytes, budget, min_grid):
    """Largest row tile dividing M that fits the budget (double-buffered row
    blocks + resident operands) while keeping >= min_grid grid steps."""
    cands = [t for t in (8192, 4096, 2048, 1024, 512, 256, 128, 64, 32, 16, 8)
             if m % t == 0]
    if not cands:
        return m
    fit = [t for t in cands if 2 * t * row_bytes + resident_bytes <= budget]
    pool = fit if fit else [cands[-1]]
    good = [t for t in pool if m // t >= min_grid]
    return (good or pool)[0]


def _pick_th(h, wp, wout, cin, cout, budget, prefer_groups=2):
    """Image-row tile for the 3x3 conv: largest divisor of H that fits the
    budget, preferring >= prefer_groups groups so the halo-DMA pipeline and
    the output/residual double buffers have something to overlap."""
    divs = [d for d in range(h, 0, -1) if h % d == 0]

    def need(th):
        win = (th + 2) * wp + 8
        return (2 * win * cin * 2                      # 2-slot halo window (bf16)
                + 2 * 2 * th * wout * cout * 2         # double-buffered res + out
                + 9 * cin * cout * 2 + 2 * cout * 4    # resident weights + BN
                + th * wp * cout * 4)                  # f32 accumulator

    fit = [d for d in divs if need(d) <= budget]
    pool = fit if fit else [divs[-1]]
    tiled = [d for d in pool if h // d >= prefer_groups]
    return (tiled or pool)[0]


# --------------------------------------------------------------------------
# Pallas kernels
# --------------------------------------------------------------------------
def _gemm_bn_silu_kernel(x_ref, w_ref, sb_ref, o_ref):
    """(TM,K) @ (K,Cout) -> folded-BN affine -> SiLU, bf16 store."""
    y = jnp.dot(x_ref[...], w_ref[...], preferred_element_type=jnp.float32)
    sb = sb_ref[...]
    y = y * sb[0:1, :] + sb[1:2, :]
    y = y * jax.nn.sigmoid(y)                 # SiLU (sigmoid -> EUP)
    o_ref[...] = y.astype(o_ref.dtype)


def _gemm_bn_silu_dual_kernel(x_ref, w_ref, sb_ref, o1_ref, o2_ref):
    """Fused cv1+cv2 with two lane-aligned outputs (used when c_ >= 128)."""
    y = jnp.dot(x_ref[...], w_ref[...], preferred_element_type=jnp.float32)
    sb = sb_ref[...]
    y = y * sb[0:1, :] + sb[1:2, :]
    y = y * jax.nn.sigmoid(y)
    c = o1_ref.shape[-1]
    o1_ref[...] = y[:, :c].astype(o1_ref.dtype)
    o2_ref[...] = y[:, c:].astype(o2_ref.dtype)


def _gemm2_bn_silu_kernel(a_ref, b_ref, wa_ref, wb_ref, sb_ref, o_ref):
    """Fused concat + 1x1 conv (C3.cv3): a@Wa + b@Wb -> BN -> SiLU."""
    y = jnp.dot(a_ref[...], wa_ref[...], preferred_element_type=jnp.float32)
    y = y + jnp.dot(b_ref[...], wb_ref[...], preferred_element_type=jnp.float32)
    sb = sb_ref[...]
    y = y * sb[0:1, :] + sb[1:2, :]
    y = y * jax.nn.sigmoid(y)
    o_ref[...] = y.astype(o_ref.dtype)


def _conv3x3_bn_silu_res_kernel(wp, wout, th, x_hbm, w_ref, sb_ref, res_ref,
                                o_ref, xwin, sem):
    """3x3 conv (9 shifted GEMMs) + BN + SiLU + residual, tiled over image rows.

    x_hbm:  (N, (H+3)*wp, Cin) zero-padded activation, HBM (pl.ANY), bf16
    w_ref:  (9, Cin, Cout)     tap-major weights (bf16, resident)
    res_ref:(th, W, Cout)      residual (y1) block, bf16
    o_ref:  (th, W, Cout)      trimmed output block, bf16
    xwin:   (2, (th+2)*wp+8, Cin) halo double buffer, sem: 2 DMA semaphores
    """
    b = pl.program_id(0)
    g = pl.program_id(1)
    n_g = pl.num_programs(1)
    rows = th * wp
    win = xwin.shape[1]
    slot = g % 2

    def start_fetch(gg, s):
        pltpu.make_async_copy(
            x_hbm.at[b, pl.ds(gg * rows, win), :], xwin.at[s], sem.at[s]).start()

    # Prime at the start of every batch image: robust to megacore splitting the
    # (parallel) batch dimension across TensorCores.
    @pl.when(g == 0)
    def _():
        start_fetch(0, 0)

    # Wait for this step's halo window (prefetched at step g-1, or just primed).
    pltpu.make_async_copy(
        x_hbm.at[b, pl.ds(0, win), :], xwin.at[slot], sem.at[slot]).wait()

    # Prefetch the next row group into the other slot (overlaps the GEMMs below).
    @pl.when(g + 1 < n_g)
    def _():
        start_fetch(g + 1, 1 - slot)

    cout = o_ref.shape[-1]
    acc = None
    for dy in range(3):
        for dx in range(3):
            off = dy * wp + dx                         # static per-tap row shift
            xt = xwin[slot, pl.ds(off, rows), :]
            part = jnp.dot(xt, w_ref[dy * 3 + dx],
                           preferred_element_type=jnp.float32)
            acc = part if acc is None else acc + part

    sb = sb_ref[...]
    y = acc * sb[0:1, :] + sb[1:2, :]
    y = y * jax.nn.sigmoid(y)
    # Trim the junk pad columns of the row-flattened shift trick and fuse the
    # Bottleneck shortcut, all in VMEM (wp is a multiple of 8 so the reshape
    # keeps the sublane tiling) -> compact, lane/row-dense output store.
    y = y.reshape(th, wp, cout)[:, :wout, :]
    y = y + res_ref[...].astype(jnp.float32)
    o_ref[...] = y.astype(o_ref.dtype)


# --------------------------------------------------------------------------
# Wrappers around pallas_call
# --------------------------------------------------------------------------
def fold_bn(p):
    inv_std = jax.lax.rsqrt(p["var"] + BN_EPS)
    scale = p["gamma"] * inv_std
    bias = p["beta"] - p["mean"] * scale
    return scale, bias


def _sb(scale, bias):
    return jnp.stack([scale, bias]).astype(jnp.float32)      # (2, Cout)


def fused_gemm_bn_silu(x2d, wmat, scale, bias, budgets, out_dtype=jnp.bfloat16):
    """x2d: (M, K); wmat: (K, Cout) -> SiLU(BN(x2d @ wmat))."""
    vmem_limit, tile_budget, min_grid = budgets
    m, k = x2d.shape
    cout = wmat.shape[1]
    row_bytes = k * 2 + cout * jnp.dtype(out_dtype).itemsize
    resident = 2 * (k * cout * 2) + 2 * cout * 4
    tm = _pick_tm(m, row_bytes, resident, tile_budget, min_grid)
    return pl.pallas_call(
        _gemm_bn_silu_kernel,
        out_shape=jax.ShapeDtypeStruct((m, cout), out_dtype),
        grid=(m // tm,),
        in_specs=[
            pl.BlockSpec((tm, k), lambda i: (i, 0)),
            _resident_spec((k, cout), lambda i: (0, 0)),      # resident weights
            _resident_spec((2, cout), lambda i: (0, 0)),      # resident scale/bias
        ],
        out_specs=pl.BlockSpec((tm, cout), lambda i: (i, 0)),
        compiler_params=pltpu.CompilerParams(
            dimension_semantics=("parallel",), vmem_limit_bytes=vmem_limit),
    )(x2d.astype(jnp.bfloat16), wmat.astype(jnp.bfloat16), _sb(scale, bias))


def fused_gemm_bn_silu_dual(x2d, wmat, scale, bias, c_split, budgets):
    """Fused cv1+cv2 GEMM emitting two separate (M, c_) bf16 outputs."""
    vmem_limit, tile_budget, min_grid = budgets
    m, k = x2d.shape
    cout = wmat.shape[1]
    row_bytes = k * 2 + cout * 2
    resident = 2 * (k * cout * 2) + 2 * cout * 4
    tm = _pick_tm(m, row_bytes, resident, tile_budget, min_grid)
    return pl.pallas_call(
        _gemm_bn_silu_dual_kernel,
        out_shape=(jax.ShapeDtypeStruct((m, c_split), jnp.bfloat16),
                   jax.ShapeDtypeStruct((m, cout - c_split), jnp.bfloat16)),
        grid=(m // tm,),
        in_specs=[
            pl.BlockSpec((tm, k), lambda i: (i, 0)),
            _resident_spec((k, cout), lambda i: (0, 0)),
            _resident_spec((2, cout), lambda i: (0, 0)),
        ],
        out_specs=(pl.BlockSpec((tm, c_split), lambda i: (i, 0)),
                   pl.BlockSpec((tm, cout - c_split), lambda i: (i, 0))),
        compiler_params=pltpu.CompilerParams(
            dimension_semantics=("parallel",), vmem_limit_bytes=vmem_limit),
    )(x2d.astype(jnp.bfloat16), wmat.astype(jnp.bfloat16), _sb(scale, bias))


def fused_concat_gemm_bn_silu(a2d, b2d, wa, wb, scale, bias, budgets):
    """SiLU(BN(concat(a,b) @ [wa; wb])) without materializing the concat."""
    vmem_limit, tile_budget, min_grid = budgets
    m, ka = a2d.shape
    kb = b2d.shape[1]
    cout = wa.shape[1]
    row_bytes = (ka + kb) * 2 + cout * 4
    resident = 2 * ((ka + kb) * cout * 2) + 2 * cout * 4
    tm = _pick_tm(m, row_bytes, resident, tile_budget, min_grid)
    return pl.pallas_call(
        _gemm2_bn_silu_kernel,
        out_shape=jax.ShapeDtypeStruct((m, cout), jnp.float32),
        grid=(m // tm,),
        in_specs=[
            pl.BlockSpec((tm, ka), lambda i: (i, 0)),
            pl.BlockSpec((tm, kb), lambda i: (i, 0)),
            _resident_spec((ka, cout), lambda i: (0, 0)),
            _resident_spec((kb, cout), lambda i: (0, 0)),
            _resident_spec((2, cout), lambda i: (0, 0)),
        ],
        out_specs=pl.BlockSpec((tm, cout), lambda i: (i, 0)),
        compiler_params=pltpu.CompilerParams(
            dimension_semantics=("parallel",), vmem_limit_bytes=vmem_limit),
    )(a2d.astype(jnp.bfloat16), b2d.astype(jnp.bfloat16),
      wa.astype(jnp.bfloat16), wb.astype(jnp.bfloat16), _sb(scale, bias))


def conv3x3_bn_silu_residual(hmid_nhwc, p, residual_nhwc, budgets):
    """PyTorch Conv(k=3, pad=1) + BN + SiLU + residual add (Bottleneck.add).

    Tiled over (batch, image-row groups); the padded activation is streamed
    from HBM with a manually double-buffered halo DMA; output is written
    trimmed in the compact NHWC layout with the residual already added.
    """
    vmem_limit, tile_budget, _ = budgets
    n, h, w, cin = hmid_nhwc.shape
    cout = p["w"].shape[0]
    wp = _round_up(w + 2, 8)        # padded row length (mult. of 8: aligned taps)
    th = _pick_th(h, wp, w, cin, cout, tile_budget)
    rpad = (h + 3) * wp             # 1 top + 2 bottom pad rows, flattened
    win = (th + 2) * wp + 8         # halo window rows per row group

    # TODO(synk): fuse this zero-pad into the producing 1x1 GEMM (write hmid
    # directly in the padded layout); it is one extra bf16 HBM pass per block.
    xp = jnp.pad(hmid_nhwc, ((0, 0), (1, 2), (1, wp - 1 - w), (0, 0)))
    xp = xp.reshape(n, rpad, cin).astype(jnp.bfloat16)
    w9 = jnp.transpose(p["w"], (2, 3, 1, 0)).reshape(9, cin, cout)
    w9 = w9.astype(jnp.bfloat16)
    scale, bias = fold_bn(p)
    res = residual_nhwc.astype(jnp.bfloat16)

    return pl.pallas_call(
        functools.partial(_conv3x3_bn_silu_res_kernel, wp, w, th),
        out_shape=jax.ShapeDtypeStruct((n, h, w, cout), jnp.bfloat16),
        grid=(n, h // th),
        in_specs=[
            pl.BlockSpec(memory_space=pl.ANY),                        # padded act (HBM)
            _resident_spec((9, cin, cout), lambda b, g: (0, 0, 0)),   # tap weights
            _resident_spec((2, cout), lambda b, g: (0, 0)),           # folded BN
            pl.BlockSpec((None, th, w, cout), lambda b, g: (b, g, 0, 0)),   # residual
        ],
        out_specs=pl.BlockSpec((None, th, w, cout), lambda b, g: (b, g, 0, 0)),
        scratch_shapes=[
            pltpu.VMEM((2, win, cin), jnp.bfloat16),
            pltpu.SemaphoreType.DMA((2,)),
        ],
        compiler_params=pltpu.CompilerParams(
            dimension_semantics=("parallel", "arbitrary"),
            vmem_limit_bytes=vmem_limit),
    )(xp, w9, _sb(scale, bias), res)


# --------------------------------------------------------------------------
# C3 forward (Pallas) — matches C3.forward semantics
# --------------------------------------------------------------------------
def _conv_w_1x1(p):
    return p["w"][:, :, 0, 0].T                                  # (Cin, Cout)


def c3_forward(x_nchw, params):
    budgets = _tpu_budgets()
    # NCHW -> NHWC with the bf16 cast fused into the same XLA pass.
    x = jnp.transpose(x_nchw, (0, 2, 3, 1)).astype(jnp.bfloat16)
    n, h, w, c1 = x.shape
    m = n * h * w
    c_ = params["cv1"]["w"].shape[0]

    # fused cv1 + cv2: shared input x, weights concatenated along Cout
    w12 = jnp.concatenate([_conv_w_1x1(params["cv1"]),
                           _conv_w_1x1(params["cv2"])], axis=1)  # (c1, 2*c_)
    s1, b1 = fold_bn(params["cv1"])
    s2, b2 = fold_bn(params["cv2"])
    scale12 = jnp.concatenate([s1, s2])
    bias12 = jnp.concatenate([b1, b2])
    if c_ >= 128:
        # lane-aligned split: two separate outputs, no wrapper column slices
        y1f, y2 = fused_gemm_bn_silu_dual(x.reshape(m, c1), w12,
                                          scale12, bias12, c_, budgets)
    else:
        y12 = fused_gemm_bn_silu(x.reshape(m, c1), w12, scale12, bias12, budgets)
        y1f, y2 = y12[:, :c_], y12[:, c_:]
    y1 = y1f.reshape(n, h, w, c_)                                # self.cv1(x)

    # Bottleneck chain: y1 = y1 + cv2_3x3(cv1_1x1(y1))   (all bf16 intermediates)
    for bp in params["m"]:
        hmid = fused_gemm_bn_silu(y1.reshape(m, c_), _conv_w_1x1(bp["cv1"]),
                                  *fold_bn(bp["cv1"]), budgets).reshape(n, h, w, c_)
        y1 = conv3x3_bn_silu_residual(hmid, bp["cv2"], y1, budgets)

    # cv3 fused with torch.cat((y1, y2), dim=1)
    w3 = _conv_w_1x1(params["cv3"])                              # (2*c_, c2)
    s3, b3 = fold_bn(params["cv3"])
    out = fused_concat_gemm_bn_silu(y1.reshape(m, c_), y2,
                                    w3[:c_], w3[c_:], s3, b3, budgets)   # (M, c2) f32
    c2 = w3.shape[1]
    return jnp.transpose(out.reshape(n, h, w, c2), (0, 3, 1, 2)) # NHWC -> NCHW


# --------------------------------------------------------------------------
# Parameter construction + pure-JAX references
# --------------------------------------------------------------------------
def init_conv_params(key, c_in, c_out, k):
    kw, kg, kb, km, kv = jax.random.split(key, 5)
    return dict(
        w=0.1 * jax.random.normal(kw, (c_out, c_in, k, k), jnp.float32),
        gamma=1.0 + 0.1 * jax.random.normal(kg, (c_out,), jnp.float32),
        beta=0.1 * jax.random.normal(kb, (c_out,), jnp.float32),
        mean=0.1 * jax.random.normal(km, (c_out,), jnp.float32),
        var=0.5 + 0.1 * jnp.abs(jax.random.normal(kv, (c_out,), jnp.float32)),
    )


def make_c3_params(key, c1, c2, n=1, e=0.5):
    c_ = int(c2 * e)
    keys = jax.random.split(key, 3 + 2 * n)
    params = {
        "cv1": init_conv_params(keys[0], c1, c_, 1),
        "cv2": init_conv_params(keys[1], c1, c_, 1),
        "cv3": init_conv_params(keys[2], 2 * c_, c2, 1),
        "m": [],
    }
    for i in range(n):
        params["m"].append({
            "cv1": init_conv_params(keys[3 + 2 * i], c_, c_, 1),  # e=1.0 in Bottleneck
            "cv2": init_conv_params(keys[4 + 2 * i], c_, c_, 3),
        })
    return params


def _ref_conv_bn_silu(x_nchw, p, k, matmul_dtype=jnp.float32):
    pad = k // 2
    y = jax.lax.conv_general_dilated(
        x_nchw.astype(matmul_dtype), p["w"].astype(matmul_dtype),
        window_strides=(1, 1), padding=[(pad, pad), (pad, pad)],
        dimension_numbers=("NCHW", "OIHW", "NCHW"),
        preferred_element_type=jnp.float32)
    scale, bias = fold_bn(p)
    y = y * scale[None, :, None, None] + bias[None, :, None, None]
    return y * jax.nn.sigmoid(y)


def ref_c3(x_nchw, params, matmul_dtype=jnp.float32, round_intermediates=False):
    f = functools.partial(_ref_conv_bn_silu, matmul_dtype=matmul_dtype)

    def rnd(t):
        if round_intermediates:
            return t.astype(jnp.bfloat16).astype(jnp.float32)
        return t

    y1 = rnd(f(x_nchw, params["cv1"], 1))
    y2 = rnd(f(x_nchw, params["cv2"], 1))
    for bp in params["m"]:
        hmid = rnd(f(y1, bp["cv1"], 1))
        y1 = rnd(y1 + f(hmid, bp["cv2"], 3))
    return f(jnp.concatenate([y1, y2], axis=1), params["cv3"], 1)


if __name__ == "__main__":
    key = jax.random.PRNGKey(0)
    kx, kp = jax.random.split(key)

    c1, c2, n_bottleneck = 16, 16, 2
    N, H, W = 2, 16, 16

    x = jax.random.normal(kx, (N, c1, H, W), jnp.float32)
    params = make_c3_params(kp, c1, c2, n=n_bottleneck)

    out = jax.block_until_ready(c3_forward(x, params))
    assert out.shape == (N, c2, H, W), out.shape

    # Tight check vs a reference using the same bf16-operand / f32-accumulate /
    # bf16-intermediate math as the Pallas pipeline.
    ref_b = jax.block_until_ready(
        ref_c3(x, params, matmul_dtype=jnp.bfloat16, round_intermediates=True))
    err_b = float(jnp.max(jnp.abs(out - ref_b)))
    # Fidelity check vs the pure-f32 (PyTorch-semantics) reference.
    ref_f = jax.block_until_ready(ref_c3(x, params, matmul_dtype=jnp.float32))
    err_f = float(jnp.max(jnp.abs(out - ref_f)))

    if err_b > 2e-2:
        raise AssertionError(f"Pallas C3 mismatch vs bf16 reference: max abs err {err_b}")
    if err_f > 2e-1:
        raise AssertionError(f"Pallas C3 drift vs f32 reference: max abs err {err_f}")

    print("KERNEL_OK")
</pallas_src>

<mosaic_0001>
module attributes {stable_mosaic.version = 11 : i64} {
  func.func @_gemm_bn_silu_kernel(%arg0: i32, %arg1: memref<128x16xbf16, #tpu.memory_space<vmem>>, %arg2: memref<16x16xbf16, #tpu.memory_space<vmem>>, %arg3: memref<2x16xf32, #tpu.memory_space<vmem>>, %arg4: memref<128x16xbf16, #tpu.memory_space<vmem>>) attributes {dimension_semantics = [#tpu.dimension_semantics<parallel>], iteration_bounds = array<i64: 4>, scalar_prefetch = 0 : i64, scratch_operands = 0 : i64, tpu.core_type = #tpu.core_type<tc>, window_params = [{transform_indices = @transform_0, window_bounds = array<i64: 128, 16>}, {pipeline_mode = #tpu.pipeline_mode<synchronous>, transform_indices = @transform_1, window_bounds = array<i64: 16, 16>}, {pipeline_mode = #tpu.pipeline_mode<synchronous>, transform_indices = @transform_2, window_bounds = array<i64: 2, 16>}, {transform_indices = @transform_3, window_bounds = array<i64: 128, 16>}]} {
    %c0 = arith.constant 0 : index
    %c0_0 = arith.constant 0 : index
    %0 = vector.load %arg1[%c0, %c0_0] : memref<128x16xbf16, #tpu.memory_space<vmem>>, vector<128x16xbf16>
    %c0_1 = arith.constant 0 : index
    %c0_2 = arith.constant 0 : index
    %1 = vector.load %arg2[%c0_1, %c0_2] : memref<16x16xbf16, #tpu.memory_space<vmem>>, vector<16x16xbf16>
    %cst = arith.constant dense<0.000000e+00> : vector<128x16xf32>
    %2 = tpu.matmul %0, %1, %cst {dimension_numbers = #tpu.dot_dimension_numbers<[1], [0], [0], [1], [0, 0, 1, 1], [], []>} : vector<128x16xbf16>, vector<16x16xbf16>, vector<128x16xf32> -> vector<128x16xf32>
    %c0_3 = arith.constant 0 : index
    %c0_4 = arith.constant 0 : index
    %3 = vector.load %arg3[%c0_3, %c0_4] : memref<2x16xf32, #tpu.memory_space<vmem>>, vector<2x16xf32>
    %4 = vector.extract_strided_slice %3 {offsets = [0, 0], sizes = [1, 16], strides = [1, 1]} : vector<2x16xf32> to vector<1x16xf32>
    %5 = vector.broadcast %4 : vector<1x16xf32> to vector<128x16xf32>
    %6 = arith.mulf %2, %5 : vector<128x16xf32>
    %7 = vector.extract_strided_slice %3 {offsets = [1, 0], sizes = [1, 16], strides = [1, 1]} : vector<2x16xf32> to vector<1x16xf32>
    %8 = vector.broadcast %7 : vector<1x16xf32> to vector<128x16xf32>
    %9 = arith.addf %6, %8 : vector<128x16xf32>
    %10 = arith.negf %9 : vector<128x16xf32>
    %11 = math.exp %10 : vector<128x16xf32>
    %cst_5 = arith.constant 1.000000e+00 : f32
    %12 = vector.broadcast %cst_5 : f32 to vector<128x16xf32>
    %13 = arith.addf %12, %11 : vector<128x16xf32>
    %14 = arith.divf %12, %13 : vector<128x16xf32>
    %15 = arith.mulf %9, %14 : vector<128x16xf32>
    %16 = arith.truncf %15 : vector<128x16xf32> to vector<128x16xbf16>
    %c0_6 = arith.constant 0 : index
    %c0_7 = arith.constant 0 : index
    %17 = vector.load %arg4[%c0_6, %c0_7] : memref<128x16xbf16, #tpu.memory_space<vmem>>, vector<128x16xbf16>
    tpu.vector_store %arg4[%c0_6, %c0_7], %16 {strides = array<i32>} : memref<128x16xbf16, #tpu.memory_space<vmem>>, vector<128x16xbf16>,
    return
  }
  func.func @transform_0(%arg0: i32) -> (i32, i32) {
    %c0_i32 = arith.constant 0 : i32
    %c0_i32_0 = arith.constant 0 : i32
    return %arg0, %c0_i32 : i32, i32
  }
  func.func @transform_1(%arg0: i32) -> (i32, i32) {
    %c0_i32 = arith.constant 0 : i32
    %c0_i32_0 = arith.constant 0 : i32
    %c0_i32_1 = arith.constant 0 : i32
    return %c0_i32, %c0_i32_0 : i32, i32
  }
  func.func @transform_2(%arg0: i32) -> (i32, i32) {
    %c0_i32 = arith.constant 0 : i32
    %c0_i32_0 = arith.constant 0 : i32
    %c0_i32_1 = arith.constant 0 : i32
    return %c0_i32, %c0_i32_0 : i32, i32
  }
  func.func @transform_3(%arg0: i32) -> (i32, i32) {
    %c0_i32 = arith.constant 0 : i32
    %c0_i32_0 = arith.constant 0 : i32
    return %arg0, %c0_i32 : i32, i32
  }
}

</mosaic_0001>

<bundles_post_ra>
// kernel: tpu_custom_call.1
= control target key start
LH: loop header
LB: loop body
LE: loop exit
PB: predicated region body
PF: predicated region fallthrough
CT: control target
= control target key end

     0   :  { %s940_s12 = smov 0   ;;  %s1289_s0 = inlined_call_operand.vmem [shape: bf16[512,16], index: 0, kind: input, shape index: {}]   ;;  %s1290_s1 = inlined_call_operand.vmem [shape: bf16[16,16], index: 1, kind: input, shape index: {}]   ;;  %s1291_s2 = inlined_call_operand.vmem [shape: f32[2,16], index: 2, kind: input, shape index: {}]   ;;  %s1292_s3 = inlined_call_operand.vmem [shape: bf16[512,16], index: 3, kind: output, shape index: {}]  }
   0x1 LB: > { %s757_s13 = sadd.s32 4294967295, %s918_s12   ;;  %p761_p0 = scmp.ge.s32.totalorder %s918_s12, 1  ;;  %s918_s12 = sphi %s940_s12, %s13_s12  }
   0x2   : > { %p138_p1 = scmp.lt.s32.totalorder %s918_s12, 5 }
   0x4   : > { %p139_p2 = pnand %p761_p0, %p138_p1 }
   0x5   : > { %s762_s16 = sshll.u32 (!%p139_p2), %s757_s13, 4 }
   0x6   : > { %142 = sbr.rel (%p139_p2) target bundleno = 239 (0xef), region = 32  ;;  %p163_p3 = scmp.lt.s32.totalorder (!%p139_p2), %s762_s16, 63 }
   0xb   : > { %v836_v0 = vld [vmem:[%s1290_s1] sm:$0xff]  ;;  %s1308_s16 = smov (!%p163_p3, %s762_s16), 63  ;;  %vm239_vm0 = vcmask 130048   ;;  %vm684_vm6 = vcmask 125952  }
   0xc   : > { %271 = vmatpush.bf16.msra.mxu0 %v836_v0  ;;  %837 = vmatpush.bf16.msra.mxu1 %v836_v0  ;;  %s763_s17 = sshll.u32 %s1308_s16, 2  ;;  %v313_v9 = vld [vmem:[%s1291_s2] sm:$0x3] }
   0xd   : > { %838 = vmatpush.bf16.msra.mxu2 %v836_v0  ;;  %839 = vmatpush.bf16.msra.mxu3 %v836_v0  ;;  %s166_s20 = scalar_lea.vmem %s1289_s0, %s763_s17  ;;  %v970_v10 = vperm.slane %v313_v9, 0  ;;  %v972_v11 = vperm.slane %v313_v9, 1  ;;  %s1089_s25 = scalar_lea.vmem %s1292_s3, %s763_s17 }
   0xe   : > { %v828_v1 = vld [vmem:[%s166_s20] sm:$0xff]  ;;  %v830_v2 = vld [vmem:[%s166_s20 + $0x10] sm:$0xff]  ;;  %v829_v5 = vld [vmem:[%s166_s20 + $0x8] sm:$0xff] }
   0xf   : > { %v832_v3 = vld [vmem:[%s166_s20 + $0x20] sm:$0xff]  ;;  %v834_v4 = vld [vmem:[%s166_s20 + $0x30] sm:$0xff]  ;;  %802 = vmatmul.msk.bf16.vlgmr.msra.gmra.mxu0 %vm239_vm0, %v828_v1  ;;  %804 = vmatmul.msk.bf16.vlgmr.msra.gmra.mxu1 %vm239_vm0, %v830_v2  ;;  %v831_v6 = vld [vmem:[%s166_s20 + $0x18] sm:$0xff] }
  0x10   : > { %806 = vmatmul.msk.bf16.vlgmr.msra.gmra.mxu2 %vm239_vm0, %v832_v3  ;;  %808 = vmatmul.msk.bf16.vlgmr.msra.gmra.mxu3 %vm239_vm0, %v834_v4  ;;  %v833_v7 = vld [vmem:[%s166_s20 + $0x28] sm:$0xff]  ;;  %v835_v8 = vld [vmem:[%s166_s20 + $0x38] sm:$0xff] }
  0x1f   : > { %803 = vmatmul.msk.bf16.gmra.mxu0 %vm239_vm0, %v829_v5  ;;  %805 = vmatmul.msk.bf16.gmra.mxu1 %vm239_vm0, %v831_v6 }
  0x20   : > { %807 = vmatmul.msk.bf16.gmra.mxu2 %vm239_vm0, %v833_v7  ;;  %809 = vmatmul.msk.bf16.gmra.mxu3 %vm239_vm0, %v835_v8 }
  0x8c   : > { %v273_v12 = vpop.f32.mrf.mxu0  ;;  %v283_v13 = vpop.f32.mrf.mxu1 }
  0x8d   : > { %v315_v14 = vmul.f32 %v970_v10, %v273_v12  ;;  %v319_v15 = vmul.f32 %v970_v10, %v283_v13 }
  0x8f   : > { %v977_v16 = vadd.f32 %v972_v11, %v315_v14  ;;  %v980_v17 = vadd.f32 %v972_v11, %v319_v15 }
  0x91   : > { %v810_v18 = vmul.f32 -1.442695, %v977_v16  ;;  %v814_v19 = vmul.f32 -1.442695, %v980_v17 }
  0x93   : > { %848 = vpow2.f32 %v810_v18  ;;  %v293_v20 = vpop.f32.mrf.mxu2  ;;  %v303_v21 = vpop.f32.mrf.mxu3 }
  0x94   : > { %850 = vpow2.f32 %v814_v19  ;;  %v323_v22 = vmul.f32 %v970_v10, %v293_v20  ;;  %v327_v23 = vmul.f32 %v970_v10, %v303_v21  ;;  %v275_v24 = vpop.f32.mrf.mxu0  ;;  %v285_v25 = vpop.f32.mrf.mxu1 }
  0x95   : > { %v316_v26 = vmul.f32 %v970_v10, %v275_v24  ;;  %v320_v27 = vmul.f32 %v970_v10, %v285_v25 }
  0x96   : > { %v989_v28 = vadd.f32 %v972_v11, %v323_v22  ;;  %v992_v29 = vadd.f32 %v972_v11, %v327_v23 }
  0x97   : > { %v995_v30 = vadd.f32 %v972_v11, %v316_v26  ;;  %v998_v31 = vadd.f32 %v972_v11, %v320_v27 }
  0x98   : > { %v818_v32 = vmul.f32 -1.442695, %v989_v28  ;;  %v822_v33 = vmul.f32 -1.442695, %v992_v29 }
  0x99   : > { %v849_v34 = vpop.eup %848  ;;  %v811_v37 = vmul.f32 -1.442695, %v995_v30  ;;  %v815_v39 = vmul.f32 -1.442695, %v998_v31 }
  0x9a   : > { %v851_v35 = vpop.eup %850  ;;  %v1002_v36 = vadd.f32 1.0, %v849_v34  ;;  %852 = vpow2.f32 %v818_v32 }
  0x9b   : > { %v1005_v38 = vadd.f32 1.0, %v851_v35  ;;  %854 = vpow2.f32 %v822_v33  ;;  %v295_v40 = vpop.f32.mrf.mxu2  ;;  %v305_v42 = vpop.f32.mrf.mxu3 }
  0x9c   : > { %856 = vrcp.f32 %v1002_v36  ;;  %v324_v41 = vmul.f32 %v970_v10, %v295_v40  ;;  %v278_v43 = vpop.f32.mrf.mxu0  ;;  %v421_v44 = vand.u32 2147483647, %v1002_v36  ;;  %v423_v45 = vand.u32 2147483648, %v1002_v36  ;;  %v288_v46 = vpop.f32.mrf.mxu1 }
  0x9d   : > { %858 = vrcp.f32 %v1005_v38  ;;  %v481_v48 = vand.u32 2147483647, %v1005_v38  ;;  %v483_v49 = vand.u32 2147483648, %v1005_v38  ;;  %v328_v53 = vmul.f32 %v970_v10, %v305_v42 }
  0x9e   : > { %860 = vpow2.f32 %v811_v37  ;;  %v1016_v50 = vadd.f32 %v972_v11, %v324_v41  ;;  %v317_v54 = vmul.f32 %v970_v10, %v278_v43  ;;  %vm417_vm1 = vweird.f32 %v1002_v36 }
  0x9f   : > { %862 = vpow2.f32 %v815_v39  ;;  %vm477_vm2 = vweird.f32 %v1005_v38  ;;  %v321_v57 = vmul.f32 %v970_v10, %v288_v46  ;;  %vm1028_vm3 = vcmp.eq.f32.partialorder %v421_v44, 8.507059e+37 }
  0xa0   : > { %v853_v47 = vpop.eup %852  ;;  %v424_v61 = vor.u32 1.1754944e-38, %v423_v45  ;;  %vm1034_vm4 = vcmp.eq.f32.partialorder %v481_v48, 8.507059e+37  ;;  %v484_v1 = vor.u32 1.1754944e-38, %v483_v49  ;;  %v819_v2 = vmul.f32 -1.442695, %v1016_v50 }
  0xa1   : > { %v855_v51 = vpop.eup %854  ;;  %v1018_v52 = vadd.f32 1.0, %v853_v47  ;;  %v1041_v5 = vadd.f32 %v972_v11, %v328_v53  ;;  %v1044_v6 = vadd.f32 %v972_v11, %v317_v54  ;;  %v1048_v9 = vadd.f32 %v972_v11, %v321_v57 }
  0xa2   : > { %v857_v55 = vpop.eup %856  ;;  %v1024_v56 = vadd.f32 1.0, %v855_v51 }
  0xa3   : > { %v859_v58 = vpop.eup %858  ;;  %v413_v59 = vmul.f32 %v857_v55, %v1002_v36  ;;  %864 = vrcp.f32 %v1018_v52  ;;  %vm418_vm5 = vweird.f32 %v857_v55  ;;  %v541_v8 = vand.u32 2147483647, %v1018_v52 }
  0xa4   : > { %v861_v62 = vpop.eup %860  ;;  %v473_v63 = vmul.f32 %v859_v58, %v1005_v38  ;;  %866 = vrcp.f32 %v1024_v56  ;;  %v543_v13 = vand.u32 2147483648, %v1018_v52  ;;  %vm478_vm7 = vweird.f32 %v859_v58  ;;  %vm419_vm9 = vmor %vm417_vm1, %vm418_vm5 }
  0xa5   : > { %v863_v3 = vpop.eup %862  ;;  %v414_v4 = vsub.f32 1.0, %v413_v59  ;;  %v1051_v14 = vadd.f32 1.0, %v861_v62  ;;  %v601_v19 = vand.u32 2147483647, %v1024_v56  ;;  %868 = vpow2.f32 %v819_v2  ;;  %vm479_vm12 = vmor %vm477_vm2, %vm478_vm7 }
  0xa6   : > { %v474_v7 = vsub.f32 1.0, %v473_v63  ;;  %v1053_v15 = vadd.f32 1.0, %v863_v3  ;;  %vm537_vm8 = vweird.f32 %v1018_v52  ;;  %v603_v22 = vand.u32 2147483648, %v1024_v56  ;;  %v298_v3 = vpop.f32.mrf.mxu2 }
  0xa7   : > { %v415_v12 = vmul.f32 %v857_v55, %v414_v4  ;;  %870 = vrcp.f32 %v1051_v14  ;;  %vm1063_vm10 = vcmp.eq.f32.partialorder %v541_v8, 8.507059e+37  ;;  %vm597_vm11 = vweird.f32 %v1024_v56 }
  0xa8   : > { %v475_v18 = vmul.f32 %v859_v58, %v474_v7  ;;  %v544_v32 = vor.u32 1.1754944e-38, %v543_v13  ;;  %872 = vrcp.f32 %v1053_v15  ;;  %v823_v33 = vmul.f32 -1.442695, %v1041_v5 }
  0xa9   : > { %v865_v20 = vpop.eup %864  ;;  %v416_v21 = vadd.f32 %v857_v55, %v415_v12  ;;  %vm1076_vm13 = vcmp.eq.f32.partialorder %v601_v19, 8.507059e+37  ;;  %v604_v41 = vor.u32 1.1754944e-38, %v603_v22  ;;  %v436_v42 = vand.u32 2147483647, %v1051_v14 }
  0xaa   : > { %v476_v23 = vadd.f32 %v859_v58, %v475_v18  ;;  %v533_v24 = vmul.f32 %v865_v20, %v1018_v52  ;;  %v867_v26 = vpop.eup %866  ;;  %vm538_vm14 = vweird.f32 %v865_v20  ;;  %874 = vpow2.f32 %v823_v33 }
  0xab   : > { %v420_v27 = vsel %vm419_vm9, %v857_v55, %v416_v21  ;;  %v593_v37 = vmul.f32 %v867_v26, %v1024_v56  ;;  %v869_v43 = vpop.eup %868  ;;  %vm598_vm15 = vweird.f32 %v867_v26  ;;  %vm539_vm0 = vmor %vm537_vm8, %vm538_vm14  ;;  %vm432_vm1 = vweird.f32 %v1051_v14 }
  0xac   : > { %v425_v34 = vsel %vm1028_vm3, %v424_v61, %v420_v27  ;;  %v480_v35 = vsel %vm479_vm12, %v859_v58, %v476_v23  ;;  %v534_v36 = vsub.f32 1.0, %v533_v24  ;;  %v1092_v48 = vadd.f32 1.0, %v869_v43  ;;  %vm599_vm3 = vmor %vm597_vm11, %vm598_vm15  ;;  %v308_v27 = vpop.f32.mrf.mxu3 }
  0xad   : > { %v652_v40 = vmul.f32 %v425_v34, %v977_v16  ;;  %v485_v38 = vsel %vm1034_vm4, %v484_v1, %v480_v35  ;;  %v594_v46 = vsub.f32 1.0, %v593_v37  ;;  %v871_v16 = vpop.eup %870  ;;  %vm1100_vm2 = vcmp.eq.f32.partialorder %v436_v42, 8.507059e+37 }
  0xae   : > { %v656_v44 = vmul.f32 %v485_v38, %v980_v17  ;;  %v535_v45 = vmul.f32 %v865_v20, %v534_v36  ;;  %v428_v54 = vmul.f32 %v871_v16, %v1051_v14  ;;  %v873_v55 = vpop.eup %872  ;;  %v438_v57 = vand.u32 2147483648, %v1051_v14  ;;  %v280_v36 = vpop.f32.mrf.mxu0 }
  0xaf   : > { %v668_v47 = vpack.c.bf16 %v652_v40, %v652_v40  ;;  %v595_v53 = vmul.f32 %v867_v26, %v594_v46  ;;  %876 = vrcp.f32 %v1092_v48  ;;  %v488_v61 = vmul.f32 %v873_v55, %v1053_v15 }
  0xb0   : > { %v672_v49 = vpack.c.bf16 %v656_v44, %v656_v44  ;;  %v536_v51 = vadd.f32 %v865_v20, %v535_v45  ;;  %v429_v60 = vsub.f32 1.0, %v428_v54  ;;  %vm433_vm4 = vweird.f32 %v871_v16  ;;  %v875_v4 = vpop.eup %874 }
  0xb1   : > { %685 = vst.msk [vmem:[%s1089_s25] sm:$0xf] %vm684_vm6, %v668_v47  ;;  %v596_v59 = vadd.f32 %v867_v26, %v595_v53  ;;  %vm492_vm5 = vweird.f32 %v1053_v15  ;;  %v496_v62 = vand.u32 2147483647, %v1053_v15  ;;  %v489_v2 = vsub.f32 1.0, %v488_v61  ;;  %vm434_vm8 = vmor %vm432_vm1, %vm433_vm4  ;;  %v300_v47 = vpop.f32.mrf.mxu2 }
  0xb2   : > { %689 = vst.msk [vmem:[%s1089_s25 + $0x10] sm:$0xf] %vm684_vm6, %v672_v49  ;;  %v540_v58 = vsel %vm539_vm0, %v865_v20, %v536_v51  ;;  %v430_v1 = vmul.f32 %v871_v16, %v429_v60  ;;  %vm493_vm7 = vweird.f32 %v873_v55  ;;  %v498_v56 = vand.u32 2147483648, %v1053_v15 }
  0xb3   : > { %v545_v52 = vsel %vm1063_vm10, %v544_v32, %v540_v58  ;;  %v600_v0 = vsel %vm599_vm3, %v867_v26, %v596_v59  ;;  %v812_v8 = vmul.f32 -1.442695, %v1044_v6  ;;  %v490_v19 = vmul.f32 %v873_v55, %v489_v2  ;;  %vm494_vm9 = vmor %vm492_vm5, %vm493_vm7 }
  0xb4   : > { %v660_v63 = vmul.f32 %v545_v52, %v989_v28  ;;  %v605_v7 = vsel %vm1076_vm13, %v604_v41, %v600_v0  ;;  %v431_v18 = vadd.f32 %v871_v16, %v430_v1  ;;  %v439_v20 = vor.u32 1.1754944e-38, %v438_v57 }
  0xb5   : > { %v664_v13 = vmul.f32 %v605_v7, %v992_v29  ;;  %v877_v28 = vpop.eup %876  ;;  %v1125_v21 = vadd.f32 1.0, %v875_v4  ;;  %878 = vpow2.f32 %v812_v8  ;;  %v816_v22 = vmul.f32 -1.442695, %v1048_v9 }
  0xb6   : > { %v676_v12 = vpack.c.bf16 %v660_v63, %v660_v63  ;;  %v435_v24 = vsel %vm434_vm8, %v871_v16, %v431_v18  ;;  %v491_v25 = vadd.f32 %v873_v55, %v490_v19  ;;  %v548_v29 = vmul.f32 %v877_v28, %v1092_v48 }
  0xb7   : > { %v680_v23 = vpack.c.bf16 %v664_v13, %v664_v13  ;;  %v440_v26 = vsel %vm1100_vm2, %v439_v20, %v435_v24  ;;  %vm497_vm10 = vcmp.eq.f32.partialorder %v496_v62, 8.507059e+37  ;;  %v499_v14 = vor.u32 1.1754944e-38, %v498_v56 }
  0xb8   : > { %693 = vst.msk [vmem:[%s1089_s25 + $0x20] sm:$0xf] %vm684_vm6, %v676_v12  ;;  %880 = vrcp.f32 %v1125_v21  ;;  %v653_v32 = vmul.f32 %v440_v26, %v995_v30  ;;  %v495_v33 = vsel %vm494_vm9, %v873_v55, %v491_v25  ;;  %v549_v34 = vsub.f32 1.0, %v548_v29 }
  0xb9   : > { %697 = vst.msk [vmem:[%s1089_s25 + $0x30] sm:$0xf] %vm684_vm6, %v680_v23  ;;  %v556_v35 = vand.u32 2147483647, %v1092_v48  ;;  %v500_v37 = vsel %vm497_vm10, %v499_v14, %v495_v33  ;;  %v558_v39 = vand.u32 2147483648, %v1092_v48  ;;  %882 = vpow2.f32 %v816_v22 }
  0xba   : > { %v325_v15 = vmul.f32 %v970_v10, %v298_v3  ;;  %v669_v40 = vpack.c.bf16 %v653_v32, %v653_v32  ;;  %v657_v38 = vmul.f32 %v500_v37, %v998_v31  ;;  %v550_v41 = vmul.f32 %v877_v28, %v549_v34  ;;  %v290_v31 = vpop.f32.mrf.mxu1  ;;  %v310_v3 = vpop.f32.mrf.mxu3 }
  0xbb   : > { %vm553_vm11 = vweird.f32 %v877_v28  ;;  %v879_v42 = vpop.eup %878  ;;  %v329_v43 = vmul.f32 %v970_v10, %v308_v27  ;;  %v318_v44 = vmul.f32 %v970_v10, %v280_v36  ;;  %vm552_vm12 = vweird.f32 %v1092_v48 }
  0xbc   : > { %v1145_v30 = vadd.f32 %v972_v11, %v325_v15  ;;  %686 = vst.msk [vmem:[%s1089_s25 + $0x4] sm:$0xf] %vm684_vm6, %v669_v40  ;;  %v673_v45 = vpack.c.bf16 %v657_v38, %v657_v38  ;;  %v551_v46 = vadd.f32 %v877_v28, %v550_v41  ;;  %v1152_v16 = vadd.f32 1.0, %v879_v42  ;;  %vm554_vm13 = vmor %vm552_vm12, %vm553_vm11 }
  0xbd   : > { %v559_v51 = vor.u32 1.1754944e-38, %v558_v39  ;;  %v1156_v54 = vadd.f32 %v972_v11, %v329_v43  ;;  %v1159_v55 = vadd.f32 %v972_v11, %v318_v44  ;;  %vm557_vm14 = vcmp.eq.f32.partialorder %v556_v35, 8.507059e+37 }
  0xbe   : > { %v881_v49 = vpop.eup %880  ;;  %v820_v53 = vmul.f32 -1.442695, %v1145_v30  ;;  %690 = vst.msk [vmem:[%s1089_s25 + $0x14] sm:$0xf] %vm684_vm6, %v673_v45  ;;  %v555_v17 = vsel %vm554_vm13, %v877_v28, %v551_v46  ;;  %884 = vrcp.f32 %v1152_v16  ;;  %v616_v59 = vand.u32 2147483647, %v1125_v21 }
  0xbf   : > { %v608_v48 = vmul.f32 %v881_v49, %v1125_v21  ;;  %v883_v57 = vpop.eup %882  ;;  %v560_v58 = vsel %vm557_vm14, %v559_v51, %v555_v17  ;;  %v322_v60 = vmul.f32 %v970_v10, %v290_v31  ;;  %v326_v61 = vmul.f32 %v970_v10, %v300_v47 }
  0xc0   : > { %v661_v52 = vmul.f32 %v560_v58, %v1016_v50  ;;  %v1169_v63 = vadd.f32 1.0, %v883_v57  ;;  %886 = vpow2.f32 %v820_v53  ;;  %v618_v0 = vand.u32 2147483648, %v1125_v21 }
  0xc1   : > { %v609_v62 = vsub.f32 1.0, %v608_v48  ;;  %v824_v1 = vmul.f32 -1.442695, %v1156_v54  ;;  %v813_v2 = vmul.f32 -1.442695, %v1159_v55  ;;  %vm613_vm15 = vweird.f32 %v881_v49 }
  0xc2   : > { %v677_v4 = vpack.c.bf16 %v661_v52, %v661_v52  ;;  %888 = vrcp.f32 %v1169_v63  ;;  %vm612_vm0 = vweird.f32 %v1125_v21  ;;  %v1177_v50 = vadd.f32 %v972_v11, %v322_v60 }
  0xc3   : > { %v610_v7 = vmul.f32 %v881_v49, %v609_v62  ;;  %890 = vpow2.f32 %v824_v1  ;;  %v1182_v12 = vadd.f32 %v972_v11, %v326_v61  ;;  %v330_v13 = vmul.f32 %v970_v10, %v310_v3  ;;  %vm614_vm1 = vmor %vm612_vm0, %vm613_vm15 }
  0xc4   : > { %v885_v56 = vpop.eup %884  ;;  %694 = vst.msk [vmem:[%s1089_s25 + $0x24] sm:$0xf] %vm684_vm6, %v677_v4  ;;  %892 = vpow2.f32 %v813_v2  ;;  %vm617_vm2 = vcmp.eq.f32.partialorder %v616_v59, 8.507059e+37  ;;  %v619_v18 = vor.u32 1.1754944e-38, %v618_v0  ;;  %v451_v28 = vand.u32 2147483647, %v1152_v16 }
  0xc5   : > { %v611_v8 = vadd.f32 %v881_v49, %v610_v7  ;;  %v443_v19 = vmul.f32 %v885_v56, %v1152_v16  ;;  %v453_v22 = vand.u32 2147483648, %v1152_v16  ;;  %v817_v23 = vmul.f32 -1.442695, %v1177_v50 }
  0xc6   : > { %v887_v20 = vpop.eup %886  ;;  %v1190_v24 = vadd.f32 %v972_v11, %v330_v13  ;;  %vm447_vm3 = vweird.f32 %v1152_v16  ;;  %v821_v27 = vmul.f32 -1.442695, %v1182_v12  ;;  %vm448_vm4 = vweird.f32 %v885_v56 }
  0xc7   : > { %v615_v21 = vsel %vm614_vm1, %v881_v49, %v611_v8  ;;  %v444_v29 = vsub.f32 1.0, %v443_v19  ;;  %v1192_v26 = vadd.f32 1.0, %v887_v20  ;;  %894 = vpow2.f32 %v817_v23  ;;  %vm449_vm7 = vmor %vm447_vm3, %vm448_vm4 }
  0xc8   : > { %v620_v25 = vsel %vm617_vm2, %v619_v18, %v615_v21  ;;  %v889_v10 = vpop.eup %888  ;;  %vm1199_vm5 = vcmp.eq.f32.partialorder %v451_v28, 8.507059e+37  ;;  %vm507_vm8 = vweird.f32 %v1169_v63  ;;  %v511_v38 = vand.u32 2147483647, %v1169_v63 }
  0xc9   : > { %v665_v14 = vmul.f32 %v620_v25, %v1041_v5  ;;  %v891_v32 = vpop.eup %890  ;;  %v445_v33 = vmul.f32 %v885_v56, %v444_v29  ;;  %v503_v34 = vmul.f32 %v889_v10, %v1169_v63  ;;  %896 = vrcp.f32 %v1192_v26 }
  0xca   : > { %v893_v11 = vpop.eup %892  ;;  %v454_v5 = vor.u32 1.1754944e-38, %v453_v22  ;;  %v1203_v15 = vadd.f32 1.0, %v891_v32  ;;  %v513_v41 = vand.u32 2147483648, %v1169_v63  ;;  %898 = vpow2.f32 %v821_v27 }
  0xcb   : > { %v681_v35 = vpack.c.bf16 %v665_v14, %v665_v14  ;;  %v446_v37 = vadd.f32 %v885_v56, %v445_v33  ;;  %v504_v39 = vsub.f32 1.0, %v503_v34  ;;  %v1205_v40 = vadd.f32 1.0, %v893_v11 }
  0xcc   : > { %vm508_vm9 = vweird.f32 %v889_v10  ;;  %900 = vrcp.f32 %v1203_v15  ;;  %v825_v46 = vmul.f32 -1.442695, %v1190_v24  ;;  %vm512_vm11 = vcmp.eq.f32.partialorder %v511_v38, 8.507059e+37 }
  0xcd   : > { %698 = vst.msk [vmem:[%s1089_s25 + $0x34] sm:$0xf] %vm684_vm6, %v681_v35  ;;  %v450_v42 = vsel %vm449_vm7, %v885_v56, %v446_v37  ;;  %v505_v43 = vmul.f32 %v889_v10, %v504_v39  ;;  %v895_v44 = vpop.eup %894  ;;  %902 = vrcp.f32 %v1205_v40  ;;  %vm509_vm10 = vmor %vm507_vm8, %vm508_vm9  ;;  %v514_v49 = vor.u32 1.1754944e-38, %v513_v41 }
  0xce   : > { %v455_v45 = vsel %vm1199_vm5, %v454_v5, %v450_v42  ;;  %v571_v48 = vand.u32 2147483647, %v1192_v26  ;;  %v573_v57 = vand.u32 2147483648, %v1192_v26  ;;  %v1225_v61 = vadd.f32 1.0, %v895_v44 }
  0xcf   : > { %v897_v16 = vpop.eup %896  ;;  %v654_v31 = vmul.f32 %v455_v45, %v1044_v6  ;;  %v506_v47 = vadd.f32 %v889_v10, %v505_v43  ;;  %904 = vpow2.f32 %v825_v46  ;;  %vm567_vm13 = vweird.f32 %v1192_v26 }
  0xd0   : > { %v563_v51 = vmul.f32 %v897_v16, %v1192_v26  ;;  %v899_v58 = vpop.eup %898  ;;  %vm568_vm12 = vweird.f32 %v897_v16  ;;  %906 = vrcp.f32 %v1225_v61  ;;  %vm1235_vm14 = vcmp.eq.f32.partialorder %v571_v48, 8.507059e+37 }
  0xd1   : > { %v670_v53 = vpack.c.bf16 %v654_v31, %v654_v31  ;;  %v510_v17 = vsel %vm509_vm10, %v889_v10, %v506_v47  ;;  %v1230_v62 = vadd.f32 1.0, %v899_v58  ;;  %vm627_vm15 = vweird.f32 %v1203_v15  ;;  %vm569_vm0 = vmor %vm567_vm13, %vm568_vm12 }
  0xd2   : > { %v515_v59 = vsel %vm512_vm11, %v514_v49, %v510_v17  ;;  %v564_v60 = vsub.f32 1.0, %v563_v51  ;;  %v901_v6 = vpop.eup %900  ;;  %v631_v8 = vand.u32 2147483647, %v1203_v15  ;;  %v633_v13 = vand.u32 2147483648, %v1203_v15 }
  0xd3   : > { %687 = vst.msk [vmem:[%s1089_s25 + $0x8] sm:$0xf] %vm684_vm6, %v670_v53  ;;  %v658_v52 = vmul.f32 %v515_v59, %v1048_v9  ;;  %v903_v63 = vpop.eup %902  ;;  %v623_v1 = vmul.f32 %v901_v6, %v1203_v15  ;;  %v574_v9 = vor.u32 1.1754944e-38, %v573_v57  ;;  %908 = vrcp.f32 %v1230_v62 }
  0xd4   : > { %v565_v0 = vmul.f32 %v897_v16, %v564_v60  ;;  %v458_v4 = vmul.f32 %v903_v63, %v1205_v40  ;;  %vm628_vm1 = vweird.f32 %v901_v6  ;;  %v468_v21 = vand.u32 2147483648, %v1205_v40 }
  0xd5   : > { %v674_v2 = vpack.c.bf16 %v658_v52, %v658_v52  ;;  %v624_v56 = vsub.f32 1.0, %v623_v1  ;;  %v905_v19 = vpop.eup %904  ;;  %vm463_vm2 = vweird.f32 %v903_v63  ;;  %v466_v25 = vand.u32 2147483647, %v1205_v40  ;;  %vm629_vm4 = vmor %vm627_vm15, %vm628_vm1 }
  0xd6   : > { %v566_v7 = vadd.f32 %v897_v16, %v565_v0  ;;  %v459_v18 = vsub.f32 1.0, %v458_v4  ;;  %v907_v29 = vpop.eup %906  ;;  %vm462_vm3 = vweird.f32 %v1205_v40  ;;  %v1252_v14 = vadd.f32 1.0, %v905_v19 }
  0xd7   : > { %691 = vst.msk [vmem:[%s1089_s25 + $0x18] sm:$0xf] %vm684_vm6, %v674_v2  ;;  %v625_v20 = vmul.f32 %v901_v6, %v624_v56  ;;  %vm632_vm5 = vcmp.eq.f32.partialorder %v631_v8, 8.507059e+37  ;;  %v634_v27 = vor.u32 1.1754944e-38, %v633_v13  ;;  %v518_v33 = vmul.f32 %v907_v29, %v1225_v61  ;;  %vm464_vm7 = vmor %vm462_vm3, %vm463_vm2 }
  0xd8   : > { %v570_v28 = vsel %vm569_vm0, %v897_v16, %v566_v7  ;;  %v460_v23 = vmul.f32 %v903_v63, %v459_v18  ;;  %v469_v35 = vor.u32 1.1754944e-38, %v468_v21  ;;  %910 = vrcp.f32 %v1252_v14 }
  0xd9   : > { %v575_v22 = vsel %vm1235_vm14, %v574_v9, %v570_v28  ;;  %v626_v10 = vadd.f32 %v901_v6, %v625_v20  ;;  %vm467_vm8 = vcmp.eq.f32.partialorder %v466_v25, 8.507059e+37  ;;  %v519_v37 = vsub.f32 1.0, %v518_v33 }
  0xda   : > { %v662_v26 = vmul.f32 %v575_v22, %v1145_v30  ;;  %v461_v32 = vadd.f32 %v903_v63, %v460_v23  ;;  %v909_v30 = vpop.eup %908  ;;  %v528_v40 = vand.u32 2147483648, %v1225_v61  ;;  %vm523_vm9 = vweird.f32 %v907_v29 }
  0xdb   : > { %v630_v11 = vsel %vm629_vm4, %v901_v6, %v626_v10  ;;  %v578_v38 = vmul.f32 %v909_v30, %v1230_v62  ;;  %v520_v42 = vmul.f32 %v907_v29, %v519_v37  ;;  %v526_v43 = vand.u32 2147483647, %v1225_v61 }
  0xdc   : > { %v678_v34 = vpack.c.bf16 %v662_v26, %v662_v26  ;;  %v635_v36 = vsel %vm632_vm5, %v634_v27, %v630_v11  ;;  %v465_v5 = vsel %vm464_vm7, %v903_v63, %v461_v32  ;;  %vm522_vm10 = vweird.f32 %v1225_v61 }
  0xdd   : > { %v666_v39 = vmul.f32 %v635_v36, %v1156_v54  ;;  %v470_v15 = vsel %vm467_vm8, %v469_v35, %v465_v5  ;;  %v579_v45 = vsub.f32 1.0, %v578_v38  ;;  %v521_v16 = vadd.f32 %v907_v29, %v520_v42  ;;  %vm524_vm11 = vmor %vm522_vm10, %vm523_vm9 }
  0xde   : > { %695 = vst.msk [vmem:[%s1089_s25 + $0x28] sm:$0xf] %vm684_vm6, %v678_v34  ;;  %v655_v41 = vmul.f32 %v470_v15, %v1159_v55  ;;  %v588_v54 = vand.u32 2147483648, %v1230_v62  ;;  %v911_v31 = vpop.eup %910  ;;  %v529_v47 = vor.u32 1.1754944e-38, %v528_v40  ;;  %vm583_vm12 = vweird.f32 %v909_v30 }
  0xdf   : > { %v682_v44 = vpack.c.bf16 %v666_v39, %v666_v39  ;;  %v580_v49 = vmul.f32 %v909_v30, %v579_v45  ;;  %v586_v55 = vand.u32 2147483647, %v1230_v62  ;;  %v525_v51 = vsel %vm524_vm11, %v907_v29, %v521_v16 }
  0xe0   : > { %v671_v46 = vpack.c.bf16 %v655_v41, %v655_v41  ;;  %vm527_vm13 = vcmp.eq.f32.partialorder %v526_v43, 8.507059e+37  ;;  %v638_v53 = vmul.f32 %v911_v31, %v1252_v14  ;;  %vm582_vm14 = vweird.f32 %v1230_v62 }
  0xe1   : > { %699 = vst.msk [vmem:[%s1089_s25 + $0x38] sm:$0xf] %vm684_vm6, %v682_v44  ;;  %v530_v17 = vsel %vm527_vm13, %v529_v47, %v525_v51  ;;  %v581_v48 = vadd.f32 %v909_v30, %v580_v49  ;;  %vm584_vm15 = vmor %vm582_vm14, %vm583_vm12  ;;  %v589_v58 = vor.u32 1.1754944e-38, %v588_v54  ;;  %vm587_vm0 = vcmp.eq.f32.partialorder %v586_v55, 8.507059e+37 }
  0xe2   : > { %688 = vst.msk [vmem:[%s1089_s25 + $0xc] sm:$0xf] %vm684_vm6, %v671_v46  ;;  %v659_v57 = vmul.f32 %v530_v17, %v1177_v50  ;;  %v639_v59 = vsub.f32 1.0, %v638_v53  ;;  %v646_v61 = vand.u32 2147483647, %v1252_v14  ;;  %v648_v6 = vand.u32 2147483648, %v1252_v14 }
  0xe3   : > { %v585_v60 = vsel %vm584_vm15, %v909_v30, %v581_v48  ;;  %vm643_vm1 = vweird.f32 %v911_v31  ;;  %vm642_vm2 = vweird.f32 %v1252_v14 }
  0xe4   : > { %v675_v52 = vpack.c.bf16 %v659_v57, %v659_v57  ;;  %v590_v63 = vsel %vm587_vm0, %v589_v58, %v585_v60  ;;  %v640_v0 = vmul.f32 %v911_v31, %v639_v59  ;;  %vm644_vm3 = vmor %vm642_vm2, %vm643_vm1  ;;  %v649_v2 = vor.u32 1.1754944e-38, %v648_v6 }
  0xe5   : > { %v663_v1 = vmul.f32 %v590_v63, %v1182_v12  ;;  %vm647_vm4 = vcmp.eq.f32.partialorder %v646_v61, 8.507059e+37 }
  0xe6   : > { %692 = vst.msk [vmem:[%s1089_s25 + $0x1c] sm:$0xf] %vm684_vm6, %v675_v52  ;;  %v641_v50 = vadd.f32 %v911_v31, %v640_v0 }
  0xe7   : > { %v679_v62 = vpack.c.bf16 %v663_v1, %v663_v1 }
  0xe8   : > { %v645_v3 = vsel %vm644_vm3, %v911_v31, %v641_v50 }
  0xe9   : > { %696 = vst.msk [vmem:[%s1089_s25 + $0x2c] sm:$0xf] %vm684_vm6, %v679_v62  ;;  %v650_v4 = vsel %vm647_vm4, %v649_v2, %v645_v3 }
  0xea   : > { %v667_v7 = vmul.f32 %v650_v4, %v1190_v24 }
  0xec   : > { %v683_v9 = vpack.c.bf16 %v667_v7, %v667_v7 }
  0xee   : > { %700 = vst.msk [vmem:[%s1089_s25 + $0x3c] sm:$0xf] %vm684_vm6, %v683_v9 }
  0xef PF: > { %s13_s12 = sadd.s32 1, %s918_s12  }
  0xf0   : > { %p10_p4 = scmp.ge.s32.totalorder %s13_s12, 6  }
  0xf2   :  { %12 = sbr.rel (!%p10_p4) target bundleno = 1 (0x1), region = 62 }

</bundles_post_ra>
